<compile_context>
chip_gen: v7x
topology: tpu7x:2x2x1
jax: 0.10.0
libtpu: 0.0.40
codegen_flags: <defaults>
</compile_context>

<pallas_src>
import jax
import jax.numpy as jnp
from jax import lax
from jax.experimental import pallas as pl
from jax.experimental.pallas import tpu as pltpu

FEAT_DIM = 512
NORM_EPS = 1e-12  # F.normalize default eps
_RHS_LANES = 128  # natural MXU lane width


def _round_up(x, m):
    return ((x + m - 1) // m) * m


def _aesthetic_head_kernel(feat_ref, rhs_ref, b_ref, out_ref):
    # feat_ref: [TB, D] (any float dtype), rhs_ref: [D, 128] f32 (lane 0 = -0.02*w),
    # b_ref: [1] f32 (SMEM, = -0.02*bias), out_ref: [TB, 1] f32.
    x = feat_ref[...].astype(jnp.float32)                              # [TB, D]

    # ||x||^2 row reduction: VPU multiply + XLU lane reduce.
    sq = jnp.sum(x * x, axis=-1, keepdims=True)                        # [TB, 1]

    # x . (-0.02*w) on the idle MXU; result lane 0 holds the dot product.
    dots = jnp.dot(x, rhs_ref[...], preferred_element_type=jnp.float32)  # [TB, 128]
    dot0 = dots[:, 0:1]                                                 # [TB, 1]

    #   -0.02 * (fn . w + b) == dot0 * rsqrt(max(||x||^2, eps^2)) + b'
    inv_norm = lax.rsqrt(jnp.maximum(sq, jnp.float32(NORM_EPS * NORM_EPS)))
    out_ref[...] = dot0 * inv_norm + b_ref[0]


def aesthetic_loss_head(features, weight, bias):
    """Pallas implementation of: -Linear(F.normalize(features.float(), dim=-1)) * 0.02.

    features: [B, 512] float (f32 or bf16; bf16 is NOT upcast wrapper-side)
    weight:   [1, 512] float  (nn.Linear(512, 1).weight)
    bias:     [1]      float  (nn.Linear(512, 1).bias)
    returns:  [B, 1]   float32
    """
    B, D = features.shape
    assert D == FEAT_DIM

    itemsize = jnp.dtype(features.dtype).itemsize

    # Batch tile selection:
    #  * tiny B: one block (per-step overhead would dominate any split),
    #  * otherwise: at least 2 blocks (v7x megacore sharding of the "parallel"
    #    axis), capped at ~4 MiB per feature block (2048 rows f32 / 4096 bf16)
    #    so the double-buffered footprint (~8 MiB) fits every generation's
    #    default scoped-VMEM limit without touching vmem_limit_bytes.
    cap = max(8, (4 * 1024 * 1024) // (FEAT_DIM * itemsize))
    if B <= 1024:
        TB = B
    else:
        TB = min(_round_up(pl.cdiv(B, 2), 8), cap)
    grid = (pl.cdiv(B, TB),)

    # Fold the negate and the 0.02 scale into the parameters; embed w' in lane 0
    # of a resident [D, 128] MXU rhs (zeros elsewhere).
    w_scaled = (-0.02) * weight.reshape(FEAT_DIM).astype(jnp.float32)
    rhs = jnp.zeros((FEAT_DIM, _RHS_LANES), jnp.float32).at[:, 0].set(w_scaled)
    b_scaled = (-0.02) * bias.reshape(1).astype(jnp.float32)

    cost = pl.CostEstimate(
        flops=2 * B * FEAT_DIM * _RHS_LANES + 3 * B * FEAT_DIM,
        transcendentals=B,
        bytes_accessed=B * FEAT_DIM * itemsize + FEAT_DIM * _RHS_LANES * 4 + B * 4,
    )

    out = pl.pallas_call(
        _aesthetic_head_kernel,
        out_shape=jax.ShapeDtypeStruct((B, 1), jnp.float32),
        grid_spec=pl.GridSpec(
            grid=grid,
            in_specs=[
                pl.BlockSpec((TB, D), lambda i: (i, 0)),                 # features tile
                pl.BlockSpec((D, _RHS_LANES), lambda i: (0, 0)),         # MXU rhs (resident)
                pl.BlockSpec(memory_space=pltpu.MemorySpace.SMEM),       # bias scalar
            ],
            out_specs=pl.BlockSpec((TB, 1), lambda i: (i, 0)),
        ),
        compiler_params=pltpu.CompilerParams(
            dimension_semantics=("parallel",),
        ),
        cost_estimate=cost,
    )(features, rhs, b_scaled)
    return out


def stand_in_encode_image(img, proj_w):
    # TODO(synk): the real CLIP ViT-B/32 image encoder is an external pretrained
    # model; replaced here by a deterministic linear projection (plain-JAX glue).
    B = img.shape[0]
    flat = img.reshape(B, -1).astype(jnp.float32)   # NCHW flattened
    feats = flat @ proj_w                           # [B, 512]
    # Keep the encoder->head handoff in bf16 (no wrapper-side upcast).
    return feats.astype(jnp.bfloat16)


if __name__ == "__main__":
    key = jax.random.PRNGKey(0)
    k_img, k_proj, k_w, k_b = jax.random.split(key, 4)

    # Small image input consistent with the module's forward (NCHW).
    B, C, H, W = 8, 3, 16, 16
    img = jax.random.normal(k_img, (B, C, H, W), jnp.float32)

    # Deterministic stand-in encoder projection and aesthetic head params.
    proj_w = jax.random.normal(k_proj, (C * H * W, FEAT_DIM), jnp.float32) * 0.02
    ae_weight = jax.random.normal(k_w, (1, FEAT_DIM), jnp.float32) * 0.05  # nn.Linear(512,1).weight
    ae_bias = jax.random.normal(k_b, (1,), jnp.float32)                    # nn.Linear(512,1).bias

    feats = stand_in_encode_image(img, proj_w)      # bf16 features, as in review

    out = aesthetic_loss_head(feats, ae_weight, ae_bias)
    out = jax.block_until_ready(out)

    # Pure-JAX reference of the module's own compute (features.float() first,
    # exactly like the PyTorch forward).
    feats_f32 = feats.astype(jnp.float32)
    fn = feats_f32 / jnp.maximum(
        jnp.linalg.norm(feats_f32, axis=-1, keepdims=True), NORM_EPS
    )
    ref = -(fn @ ae_weight.T + ae_bias) * 0.02

    assert out.shape == (B, 1)
    assert jnp.allclose(out, ref, atol=5e-5, rtol=1e-5), (
        f"max abs err = {jnp.max(jnp.abs(out - ref))}"
    )
    print("KERNEL_OK")
</pallas_src>

<mosaic_0001>
module attributes {stable_mosaic.version = 11 : i64} {
  func.func @_aesthetic_head_kernel(%arg0: i32, %arg1: memref<8x512xbf16, #tpu.memory_space<vmem>>, %arg2: memref<512x128xf32, #tpu.memory_space<vmem>>, %arg3: memref<1xf32, #tpu.memory_space<smem>>, %arg4: memref<8x1xf32, #tpu.memory_space<vmem>>) attributes {dimension_semantics = [#tpu.dimension_semantics<parallel>], iteration_bounds = array<i64: 1>, scalar_prefetch = 0 : i64, scratch_operands = 0 : i64, tpu.core_type = #tpu.core_type<tc>, window_params = [{transform_indices = @transform_0, window_bounds = array<i64: 8, 512>}, {pipeline_mode = #tpu.pipeline_mode<synchronous>, transform_indices = @transform_1, window_bounds = array<i64: 512, 128>}, {transform_indices = @transform_2, window_bounds = array<i64: 1>}, {transform_indices = @transform_3, window_bounds = array<i64: 8, 1>}]} {
    %c0 = arith.constant 0 : index
    %c0_0 = arith.constant 0 : index
    %0 = vector.load %arg1[%c0, %c0_0] : memref<8x512xbf16, #tpu.memory_space<vmem>>, vector<8x512xbf16>
    %1 = arith.extf %0 : vector<8x512xbf16> to vector<8x512xf32>
    %2 = arith.mulf %1, %1 : vector<8x512xf32>
    %cst = arith.constant dense<0.000000e+00> : vector<8xf32>
    %3 = vector.multi_reduction <add>, %2, %cst [1] : vector<8x512xf32> to vector<8xf32>
    %4 = vector.shape_cast %3 : vector<8xf32> to vector<8x1xf32>
    %c0_1 = arith.constant 0 : index
    %c0_2 = arith.constant 0 : index
    %5 = vector.load %arg2[%c0_1, %c0_2] : memref<512x128xf32, #tpu.memory_space<vmem>>, vector<512x128xf32>
    %cst_3 = arith.constant dense<0.000000e+00> : vector<8x128xf32>
    %6 = tpu.matmul %1, %5, %cst_3 {dimension_numbers = #tpu.dot_dimension_numbers<[1], [0], [0], [1], [0, 0, 1, 1], [], []>} : vector<8x512xf32>, vector<512x128xf32>, vector<8x128xf32> -> vector<8x128xf32>
    %7 = vector.extract_strided_slice %6 {offsets = [0, 0], sizes = [8, 1], strides = [1, 1]} : vector<8x128xf32> to vector<8x1xf32>
    %cst_4 = arith.constant 1.000000e-24 : f32
    %8 = vector.broadcast %cst_4 : f32 to vector<8x1xf32>
    %9 = arith.maximumf %4, %8 : vector<8x1xf32>
    %10 = math.rsqrt %9 : vector<8x1xf32>
    %11 = arith.mulf %7, %10 : vector<8x1xf32>
    %c0_5 = arith.constant 0 : index
    %12 = memref.load %arg3[%c0_5] : memref<1xf32, #tpu.memory_space<smem>>
    %13 = vector.broadcast %12 : f32 to vector<8x1xf32>
    %14 = arith.addf %11, %13 : vector<8x1xf32>
    %c0_6 = arith.constant 0 : index
    %c0_7 = arith.constant 0 : index
    %15 = vector.load %arg4[%c0_6, %c0_7] : memref<8x1xf32, #tpu.memory_space<vmem>>, vector<8x1xf32>
    tpu.vector_store %arg4[%c0_6, %c0_7], %14 {strides = array<i32>} : memref<8x1xf32, #tpu.memory_space<vmem>>, vector<8x1xf32>,
    return
  }
  func.func @transform_0(%arg0: i32) -> (i32, i32) {
    %c0_i32 = arith.constant 0 : i32
    %c0_i32_0 = arith.constant 0 : i32
    return %arg0, %c0_i32 : i32, i32
  }
  func.func @transform_1(%arg0: i32) -> (i32, i32) {
    %c0_i32 = arith.constant 0 : i32
    %c0_i32_0 = arith.constant 0 : i32
    %c0_i32_1 = arith.constant 0 : i32
    return %c0_i32, %c0_i32_0 : i32, i32
  }
  func.func @transform_2(%arg0: i32) -> i32 {
    %c0_i32 = arith.constant 0 : i32
    %c0_i32_0 = arith.constant 0 : i32
    return %c0_i32 : i32
  }
  func.func @transform_3(%arg0: i32) -> (i32, i32) {
    %c0_i32 = arith.constant 0 : i32
    %c0_i32_0 = arith.constant 0 : i32
    return %arg0, %c0_i32 : i32, i32
  }
}

</mosaic_0001>

<bundles_post_ra>
// kernel: tpu_custom_call.1
= control target key start
LH: loop header
LB: loop body
LE: loop exit
PB: predicated region body
PF: predicated region fallthrough
CT: control target
= control target key end

     0   :  { %9 = vsyncpa [#allocation4], 0  ;;  %s523_s0 = inlined_call_operand.hbm [shape: bf16[8,512], index: 0, kind: input, shape index: {}]   ;;  %s524_s1 = inlined_call_operand.hbm [shape: f32[512,128], index: 1, kind: input, shape index: {}]   ;;  %s525_s2 = inlined_call_operand.<no memory space> [shape: f32[1], index: 2, kind: input, shape index: {}]   ;;  %s526_s3 = inlined_call_operand.vmem [shape: f32[8,1], index: 3, kind: output, shape index: {}]  }
   0x1   :  { %10 = vsyncpa [#allocation6], 0  ;;  %s462_s12 = smov [#allocation3]   ;;  %s463_s14 = smov [#allocation5]  }
   0x2   :  { %s17_s13 = sshll.u32 %s462_s12, 4  ;;  %s26_s15 = sshll.u32 %s463_s14, 4  ;;  %s18_s13 = int_to_ptr.vmem [resolvable:$true] %s17_s13  ;;  %s486_s15 = int_to_ptr.vmem [resolvable:$true] %s26_s15 }
   0x3   :  { %s414_s18 = scalar_lea.hbm %s523_s0, 256 }
   0x4   :  { %p415_p0 = scmp.ne.s32.totalorder %s523_s0, %s414_s18  ;;  %p418_p1 = scmp.lt.u32.totalorder %s414_s18, %s523_s0 }
   0x6   :  { %p420_p2 = pnand %p418_p1, %p415_p0 }
   0x8   :  { %423 = shalt.err (!%p420_p2)
}
   0x9   :  { %s424_s23 = scalar_lea.vmem %s18_s13, 256  ;;  %p429_p4 = scmp.lt.s32.totalorder %s18_s13, %s18_s13 }
   0xa   :  { %p425_p3 = scmp.ne.s32.totalorder %s18_s13, %s424_s23  ;;  %p430_p5 = scmp.lt.s32.totalorder %s424_s23, %s424_s23 }
   0xc   :  { %p431_p6 = por %p430_p5, %p429_p4 }
   0xe   :  { %p432_p7 = pnand %p431_p6, %p425_p3 }
  0x10   :  { %435 = shalt.err (!%p432_p7)
}
  0x11   :  { %20 = dma.hbm_to_vmem [thread:$0]  %s523_s0, 256, %s18_s13, [#allocation4]  }
  0x12   :  { %s436_s28 = scalar_lea.hbm %s524_s1, 8192 }
  0x13   :  { %p437_p8 = scmp.ne.s32.totalorder %s524_s1, %s436_s28  ;;  %p440_p9 = scmp.lt.u32.totalorder %s436_s28, %s524_s1 }
  0x15   :  { %p442_p10 = pnand %p440_p9, %p437_p8 }
  0x17   :  { %445 = shalt.err (!%p442_p10)
}
  0x18   :  { %s446_s6 = scalar_lea.vmem %s486_s15, 8192  ;;  %p451_p12 = scmp.lt.s32.totalorder %s486_s15, %s486_s15 }
  0x19   :  { %p447_p11 = scmp.ne.s32.totalorder %s486_s15, %s446_s6  ;;  %p452_p13 = scmp.lt.s32.totalorder %s446_s6, %s446_s6 }
  0x1b   :  { %p453_p0 = por %p452_p13, %p451_p12 }
  0x1d   :  { %p454_p1 = pnand %p453_p0, %p447_p11 }
  0x1f   :  { %457 = shalt.err (!%p454_p1)
}
  0x20   :  { %s464_s0 = smov 128   ;;  %s465_s7 = smov 8  }
  0x21   :  { %32 = dma.hbm_to_vmem [thread:$0]  %s524_s1, 8192, %s486_s15, [#allocation6], %s464_s0, %s464_s0, %s465_s7  }
  0x22   :  { %458 = dma.done.wait [#allocation4], 256  }
  0x23   :  { %459 = vsyncadd [#allocation4], 4294967040 }
  0x24   :  { %460 = dma.done.wait [#allocation6], 8192  }
  0x25   :  { %461 = vsyncadd [#allocation6], 4294959104  ;;  %v72_v0 = vld [vmem:[#allocation5 + $0x80] sm:$0xff]  ;;  %v73_v1 = vld [vmem:[#allocation5 + $0x88] sm:$0xff]  ;;  %vm266_vm0 = vcmask 7168  }
  0x26   :  { %v104_v2 = vld [vmem:[#allocation5 + $0x180] sm:$0xff]  ;;  %v344_v3 = vpack.c.bf16 %v73_v1, %v72_v0  ;;  %v105_v4 = vld [vmem:[#allocation5 + $0x188] sm:$0xff]  ;;  %v74_v11 = vld [vmem:[#allocation5 + $0x90] sm:$0xff] }
  0x27   :  { %v56_v5 = vld [vmem:[#allocation5] sm:$0xff]  ;;  %v57_v6 = vld [vmem:[#allocation5 + $0x8] sm:$0xff]  ;;  %v376_v7 = vpack.c.bf16 %v105_v4, %v104_v2  ;;  %v75_v13 = vld [vmem:[#allocation5 + $0x98] sm:$0xff] }
  0x28   :  { %v346_v8 = vpack.c.bf16 %v57_v6, %v56_v5  ;;  %v88_v9 = vld [vmem:[#allocation5 + $0x100] sm:$0xff]  ;;  %v89_v10 = vld [vmem:[#allocation5 + $0x108] sm:$0xff]  ;;  %345 = vmatprep.subr.bf16.mxu0 %v344_v3  ;;  %v106_v14 = vld [vmem:[#allocation5 + $0x190] sm:$0xff]  ;;  %v348_v16 = vpack.c.bf16 %v75_v13, %v74_v11 }
  0x29   :  { %v378_v12 = vpack.c.bf16 %v89_v10, %v88_v9  ;;  %v107_v15 = vld [vmem:[#allocation5 + $0x198] sm:$0xff]  ;;  %377 = vmatprep.subr.bf16.mxu1 %v376_v7  ;;  %v58_v18 = vld [vmem:[#allocation5 + $0x10] sm:$0xff]  ;;  %v76_v23 = vld [vmem:[#allocation5 + $0xa0] sm:$0xff] }
  0x2a   :  { %347 = vmatpush3.bf16.msra.mxu0 %v346_v8  ;;  %v380_v17 = vpack.c.bf16 %v107_v15, %v106_v14  ;;  %v59_v19 = vld [vmem:[#allocation5 + $0x18] sm:$0xff]  ;;  %v90_v20 = vld [vmem:[#allocation5 + $0x110] sm:$0xff]  ;;  %v77_v24 = vld [vmem:[#allocation5 + $0xa8] sm:$0xff] }
  0x2b   :  { %379 = vmatpush3.bf16.msra.mxu1 %v378_v12  ;;  %v350_v21 = vpack.c.bf16 %v59_v19, %v58_v18  ;;  %v91_v22 = vld [vmem:[#allocation5 + $0x118] sm:$0xff]  ;;  %349 = vmatprep.subr.bf16.mxu0 %v348_v16  ;;  %v352_v26 = vpack.c.bf16 %v77_v24, %v76_v23  ;;  %v108_v27 = vld [vmem:[#allocation5 + $0x1a0] sm:$0xff]  ;;  %v109_v28 = vld [vmem:[#allocation5 + $0x1a8] sm:$0xff] }
  0x2c   :  { %381 = vmatprep.subr.bf16.mxu1 %v380_v17  ;;  %v382_v25 = vpack.c.bf16 %v91_v22, %v90_v20  ;;  %v60_v29 = vld [vmem:[#allocation5 + $0x20] sm:$0xff]  ;;  %v384_v30 = vpack.c.bf16 %v109_v28, %v108_v27  ;;  %v61_v31 = vld [vmem:[#allocation5 + $0x28] sm:$0xff]  ;;  %v78_v35 = vld [vmem:[#allocation5 + $0xb0] sm:$0xff] }
  0x2d   :  { %v92_v32 = vld [vmem:[#allocation5 + $0x120] sm:$0xff]  ;;  %v93_v33 = vld [vmem:[#allocation5 + $0x128] sm:$0xff]  ;;  %v354_v34 = vpack.c.bf16 %v61_v31, %v60_v29  ;;  %v79_v36 = vld [vmem:[#allocation5 + $0xb8] sm:$0xff] }
  0x2e   :  { %351 = vmatpush3.bf16.msra.mxu0 %v350_v21  ;;  %v110_v37 = vld [vmem:[#allocation5 + $0x1b0] sm:$0xff]  ;;  %v386_v38 = vpack.c.bf16 %v93_v33, %v92_v32  ;;  %v356_v39 = vpack.c.bf16 %v79_v36, %v78_v35  ;;  %v111_v40 = vld [vmem:[#allocation5 + $0x1b8] sm:$0xff]  ;;  %v80_v46 = vld [vmem:[#allocation5 + $0xc0] sm:$0xff] }
  0x2f   :  { %383 = vmatpush3.bf16.msra.mxu1 %v382_v25  ;;  %353 = vmatprep.subr.bf16.mxu0 %v352_v26  ;;  %v62_v41 = vld [vmem:[#allocation5 + $0x30] sm:$0xff]  ;;  %v63_v42 = vld [vmem:[#allocation5 + $0x38] sm:$0xff]  ;;  %v388_v43 = vpack.c.bf16 %v111_v40, %v110_v37  ;;  %v81_v47 = vld [vmem:[#allocation5 + $0xc8] sm:$0xff] }
  0x30   :  { %385 = vmatprep.subr.bf16.mxu1 %v384_v30  ;;  %v94_v44 = vld [vmem:[#allocation5 + $0x130] sm:$0xff]  ;;  %v95_v45 = vld [vmem:[#allocation5 + $0x138] sm:$0xff]  ;;  %v112_v48 = vld [vmem:[#allocation5 + $0x1c0] sm:$0xff]  ;;  %v358_v50 = vpack.c.bf16 %v63_v42, %v62_v41  ;;  %v360_v52 = vpack.c.bf16 %v81_v47, %v80_v46 }
  0x31   :  { %v113_v49 = vld [vmem:[#allocation5 + $0x1c8] sm:$0xff]  ;;  %v390_v51 = vpack.c.bf16 %v95_v45, %v94_v44  ;;  %v64_v53 = vld [vmem:[#allocation5 + $0x40] sm:$0xff]  ;;  %v82_v58 = vld [vmem:[#allocation5 + $0xd0] sm:$0xff] }
  0x32   :  { %355 = vmatpush3.bf16.msra.mxu0 %v354_v34  ;;  %v65_v54 = vld [vmem:[#allocation5 + $0x48] sm:$0xff]  ;;  %v96_v55 = vld [vmem:[#allocation5 + $0x140] sm:$0xff]  ;;  %v392_v56 = vpack.c.bf16 %v113_v49, %v112_v48  ;;  %v83_v59 = vld [vmem:[#allocation5 + $0xd8] sm:$0xff] }
  0x33   :  { %387 = vmatpush3.bf16.msra.mxu1 %v386_v38  ;;  %357 = vmatprep.subr.bf16.mxu0 %v356_v39  ;;  %v97_v57 = vld [vmem:[#allocation5 + $0x148] sm:$0xff]  ;;  %v114_v60 = vld [vmem:[#allocation5 + $0x1d0] sm:$0xff]  ;;  %v115_v61 = vld [vmem:[#allocation5 + $0x1d8] sm:$0xff]  ;;  %v362_v62 = vpack.c.bf16 %v65_v54, %v64_v53  ;;  %v364_v0 = vpack.c.bf16 %v83_v59, %v82_v58 }
  0x34   :  { %389 = vmatprep.subr.bf16.mxu1 %v388_v43  ;;  %v394_v63 = vpack.c.bf16 %v97_v57, %v96_v55  ;;  %v66_v1 = vld [vmem:[#allocation5 + $0x50] sm:$0xff]  ;;  %v67_v2 = vld [vmem:[#allocation5 + $0x58] sm:$0xff]  ;;  %v396_v4 = vpack.c.bf16 %v115_v61, %v114_v60  ;;  %v84_v6 = vld [vmem:[#allocation5 + $0xe0] sm:$0xff]  ;;  %v264_v55 = vstv %s525_s2 }
  0x35   :  { %v98_v3 = vld [vmem:[#allocation5 + $0x150] sm:$0xff]  ;;  %v99_v5 = vld [vmem:[#allocation5 + $0x158] sm:$0xff]  ;;  %v85_v7 = vld [vmem:[#allocation5 + $0xe8] sm:$0xff]  ;;  %v366_v10 = vpack.c.bf16 %v67_v2, %v66_v1 }
  0x36   :  { %359 = vmatpush3.bf16.msra.mxu0 %v358_v50  ;;  %v116_v8 = vld [vmem:[#allocation5 + $0x1e0] sm:$0xff]  ;;  %v117_v9 = vld [vmem:[#allocation5 + $0x1e8] sm:$0xff]  ;;  %v398_v13 = vpack.c.bf16 %v99_v5, %v98_v3  ;;  %v368_v14 = vpack.c.bf16 %v85_v7, %v84_v6  ;;  %v41_v16 = vld [vmem:[#allocation3] sm:$0xff] }
  0x37   :  { %391 = vmatpush3.bf16.msra.mxu1 %v390_v51  ;;  %361 = vmatprep.subr.bf16.mxu0 %v360_v52  ;;  %v68_v11 = vld [vmem:[#allocation5 + $0x60] sm:$0xff]  ;;  %v69_v12 = vld [vmem:[#allocation5 + $0x68] sm:$0xff]  ;;  %v42_v17 = vld [vmem:[#allocation3 + $0x8] sm:$0xff]  ;;  %v400_v18 = vpack.c.bf16 %v117_v9, %v116_v8  ;;  %v43_v22 = vunpack.c.l.bf16 %v41_v16  ;;  %v44_v23 = vunpack.c.h.bf16 %v41_v16 }
  0x38   :  { %393 = vmatprep.subr.bf16.mxu1 %v392_v56  ;;  %v100_v15 = vld [vmem:[#allocation5 + $0x160] sm:$0xff]  ;;  %v101_v19 = vld [vmem:[#allocation5 + $0x168] sm:$0xff]  ;;  %v86_v20 = vld [vmem:[#allocation5 + $0xf0] sm:$0xff]  ;;  %v45_v24 = vunpack.c.l.bf16 %v42_v17  ;;  %v370_v25 = vpack.c.bf16 %v69_v12, %v68_v11  ;;  %v46_v28 = vunpack.c.h.bf16 %v42_v17 }
  0x39   :  { %v87_v21 = vld [vmem:[#allocation5 + $0xf8] sm:$0xff]  ;;  %v118_v26 = vld [vmem:[#allocation5 + $0x1f0] sm:$0xff]  ;;  %v47_v29 = vmul.f32 %v43_v22, %v43_v22  ;;  %v48_v30 = vmul.f32 %v44_v23, %v44_v23  ;;  %184 = vmatprep.mubr.f32.mxu0 %v44_v23  ;;  %v402_v32 = vpack.c.bf16 %v101_v19, %v100_v15 }
  0x3a   :  { %363 = vmatpush3.bf16.msra.mxu0 %v362_v62  ;;  %v119_v27 = vld [vmem:[#allocation5 + $0x1f8] sm:$0xff]  ;;  %v49_v31 = vmul.f32 %v45_v24, %v45_v24  ;;  %v372_v33 = vpack.c.bf16 %v87_v21, %v86_v20  ;;  %v70_v34 = vld [vmem:[#allocation5 + $0x70] sm:$0xff]  ;;  %254 = vmatprep.mubr.f32.mxu1 %v46_v28  ;;  %v50_v39 = vmul.f32 %v46_v28, %v46_v28 }
  0x3b   :  { %395 = vmatpush3.bf16.msra.mxu1 %v394_v63  ;;  %365 = vmatprep.subr.bf16.mxu0 %v364_v0  ;;  %v71_v35 = vld [vmem:[#allocation5 + $0x78] sm:$0xff]  ;;  %v404_v36 = vpack.c.bf16 %v119_v27, %v118_v26  ;;  %v102_v37 = vld [vmem:[#allocation5 + $0x170] sm:$0xff]  ;;  %v51_v40 = vadd.f32 %v48_v30, %v47_v29 }
  0x3c   :  { %397 = vmatprep.subr.bf16.mxu1 %v396_v4  ;;  %v103_v38 = vld [vmem:[#allocation5 + $0x178] sm:$0xff]  ;;  %v374_v41 = vpack.c.bf16 %v71_v35, %v70_v34 }
  0x3d   :  { %v52_v42 = vadd.f32 %v51_v40, %v49_v31  ;;  %v406_v43 = vpack.c.bf16 %v103_v38, %v102_v37 }
  0x3e   :  { %367 = vmatpush3.bf16.msra.mxu0 %v366_v10 }
  0x3f   :  { %399 = vmatpush3.bf16.msra.mxu1 %v398_v13  ;;  %369 = vmatprep.subr.bf16.mxu0 %v368_v14  ;;  %v53_v44 = vadd.f32 %v52_v42, %v50_v39 }
  0x40   :  { %401 = vmatprep.subr.bf16.mxu1 %v400_v18 }
  0x41   :  { %54 = vadd.xlane.f32.xlu0 %v53_v44 }
  0x42   :  { %371 = vmatpush3.bf16.msra.mxu0 %v370_v25 }
  0x43   :  { %403 = vmatpush3.bf16.msra.mxu1 %v402_v32  ;;  %373 = vmatprep.subr.bf16.mxu0 %v372_v33 }
  0x44   :  { %405 = vmatprep.subr.bf16.mxu1 %v404_v36 }
  0x46   :  { %375 = vmatpush3.bf16.msra.mxu0 %v374_v41 }
  0x47   :  { %407 = vmatpush3.bf16.msra.mxu1 %v406_v43 }
  0x49   :  { %185 = vmatmul.mubr.f32.vlgmr.msra.gmra.mrb[0].mxu0 %v43_v22 }
  0x4a   :  { %255 = vmatmul.mubr.f32.vlgmr.msra.gmra.mrb[0].mxu1 %v45_v24 }
  0xce   :  { %v55_v45 = vpop.xlane.xlu0 %54 }
  0xcf   :  { %v260_v46 = vmax.f32 %v55_v45, 1e-24 }
  0xd1   :  { %412 = vrsqrt.f32 %v260_v46 }
  0xdb   :  { %v413_v53 = vpop.eup %412 }
 0x11c   :  { %v306_v47 = vpop.f32.mrb[0].mxu0 }
 0x11d   :  { %v341_v48 = vpop.f32.mrb[0].mxu1  ;;  %v307_v49 = vpop.f32.mrb[1].mxu0 }
 0x11e   :  { %v308_v50 = vadd.f32 %v307_v49, %v306_v47  ;;  %v342_v51 = vpop.f32.mrb[1].mxu1 }
 0x11f   :  { %v343_v52 = vadd.f32 %v342_v51, %v341_v48 }
 0x121   :  { %v257_v54 = vadd.f32 %v343_v52, %v308_v50 }
 0x123   :  { %v262_v56 = vmul.f32 %v413_v53, %v257_v54 }
 0x125   :  { %v265_v57 = vadd.f32 %v264_v55, %v262_v56 }
 0x127   :  { %267 = vst.msk [vmem:[%s526_s3] sm:$0xff] %vm266_vm0, %v265_v57 }
 0x128   :  { %272 = vsyncpa [#allocation4], 1 }
 0x129   :  { %273 = vsyncpa [#allocation6], 1 }

</bundles_post_ra>
